<compile_context>
chip_gen: v7x
topology: tpu7x:2x2x1
jax: 0.10.0
libtpu: 0.0.40
codegen_flags: <defaults>
</compile_context>

<pallas_src>
import functools

import jax
import jax.numpy as jnp
from jax import lax
from jax.experimental import pallas as pl
from jax.experimental.pallas import tpu as pltpu


# ---------------------------------------------------------------------------
# Kernels
# ---------------------------------------------------------------------------


def _ffn_kernel_resident(x_ref, wi_ref, wo_ref, o_ref, acc_ref, *, kc, nc):
    """Weights fully VMEM-resident; d_ff swept by an in-kernel chunk loop.

    x_ref:   (tm, d_model)        token tile
    wi_ref:  (d_ff, d_model)      full wi (torch nn.Linear layout)
    wo_ref:  (d_model, d_ff)      full wo (torch nn.Linear layout)
    o_ref:   (tm, d_model)        output tile
    acc_ref: (tm, d_model) f32    accumulator scratch
    """
    if nc == 1:
        # Single chunk: no dynamic slicing / loop needed.
        h = lax.dot_general(x_ref[...], wi_ref[...],
                            (((1,), (1,)), ((), ())),
                            preferred_element_type=jnp.float32)
        h = jnp.maximum(h, 0.0)                     # ReLU (dense_act_fn="relu")
        # TODO(synk): dropout is identity in eval mode; training-mode dropout
        # (pltpu.prng_random_bits mask) is not emitted here.
        h = h.astype(wo_ref.dtype)                  # torch cast to wo dtype
        o_ref[...] = lax.dot_general(h, wo_ref[...],
                                     (((1,), (1,)), ((), ())),
                                     preferred_element_type=jnp.float32
                                     ).astype(o_ref.dtype)
        return

    acc_ref[...] = jnp.zeros_like(acc_ref)

    def body(c, carry):
        # nc > 1 implies kc is a multiple of 128, so slice starts are aligned.
        off = pl.multiple_of(c * kc, 128)
        wi_c = wi_ref[pl.ds(off, kc), :]            # (kc, d_model)
        wo_c = wo_ref[:, pl.ds(off, kc)]            # (d_model, kc)
        # h_chunk = x @ wi_c.T  -> (tm, kc), f32 accumulation on the MXU.
        h = lax.dot_general(x_ref[...], wi_c,
                            (((1,), (1,)), ((), ())),
                            preferred_element_type=jnp.float32)
        h = jnp.maximum(h, 0.0)
        h = h.astype(wo_ref.dtype)
        # acc += h_chunk @ wo_c.T -> (tm, d_model)
        acc_ref[...] += lax.dot_general(h, wo_c,
                                        (((1,), (1,)), ((), ())),
                                        preferred_element_type=jnp.float32)
        return carry

    lax.fori_loop(0, nc, body, 0)
    o_ref[...] = acc_ref[...].astype(o_ref.dtype)


def _ffn_kernel_streamed(x_ref, wi_ref, wo_ref, o_ref, acc_ref):
    """d_ff streamed as the last ("arbitrary") grid axis in kc-chunks.

    x_ref:   (tm, d_model)      token tile
    wi_ref:  (kc, d_model)      d_ff-chunk of wi (torch layout [d_ff, d_model])
    wo_ref:  (d_model, kc)      d_ff-chunk of wo (torch layout [d_model, d_ff])
    o_ref:   (tm, d_model)      output tile
    acc_ref: (tm, d_model) f32  accumulator, resident across the d_ff axis
    """
    k = pl.program_id(1)

    @pl.when(k == 0)
    def _():
        acc_ref[...] = jnp.zeros_like(acc_ref)

    h = lax.dot_general(x_ref[...], wi_ref[...],
                        (((1,), (1,)), ((), ())),
                        preferred_element_type=jnp.float32)
    h = jnp.maximum(h, 0.0)                         # ReLU
    h = h.astype(wo_ref.dtype)
    acc_ref[...] += lax.dot_general(h, wo_ref[...],
                                    (((1,), (1,)), ((), ())),
                                    preferred_element_type=jnp.float32)

    @pl.when(k == pl.num_programs(1) - 1)
    def _():
        o_ref[...] = acc_ref[...].astype(o_ref.dtype)


# ---------------------------------------------------------------------------
# Planning helpers (all static / trace-time Python)
# ---------------------------------------------------------------------------


def _round_up(n, m):
    return ((n + m - 1) // m) * m


def _pick_dff_chunk(d_ff, target):
    """Largest chunk <= target that divides d_ff and is a multiple of 128;
    falls back to the full d_ff (single chunk) if none exists."""
    if d_ff <= target:
        return d_ff
    kc = (min(target, d_ff) // 128) * 128
    while kc >= 128:
        if d_ff % kc == 0:
            return kc
        kc -= 128
    return d_ff


@functools.lru_cache(maxsize=1)
def _vmem_capacity_bytes():
    try:
        return int(pltpu.get_tpu_info().vmem_capacity_bytes)
    except Exception:
        return 64 * 1024 * 1024  # conservative: v7x per-TensorCore VMEM


def _plan(M, d_model, d_ff, act_bytes, w_el_bytes, out_bytes, mode):
    """Pick (resident?, tm, kc, vmem_limit) from shapes, dtypes, VMEM size."""
    cap = _vmem_capacity_bytes()
    budget = int(cap * 0.75)          # headroom for Mosaic scratch/semaphores
    w_total = 2 * d_model * d_ff * w_el_bytes          # wi + wo

    M8 = _round_up(max(M, 1), 8)

    def pick_tm(target):
        if M8 <= target:
            if M8 > 256:              # split into >=2 tiles so both v7x TCs work
                return _round_up((M8 + 1) // 2, 8)
            return M8
        return target                 # M8 > target  ->  >=2 tiles automatically

    def need_bytes(tm, resident, kc):
        b = 2 * tm * d_model * act_bytes               # x tile, double-buffered
        b += 2 * tm * d_model * out_bytes              # out tile, double-buffered
        b += tm * d_model * 4                          # f32 accumulator scratch
        if resident:
            b += 2 * w_total                           # worst case: both buffers
        else:
            b += 2 * 2 * d_model * kc * w_el_bytes     # wi & wo chunks, 2x buffered
        return b

    kc = _pick_dff_chunk(d_ff, 1024)

    if mode == "resident":
        resident = True
    elif mode == "streamed":
        resident = False
    else:
        resident = need_bytes(pick_tm(512), True, kc) <= budget

    if resident:
        tm = pick_tm(512)
        while need_bytes(tm, True, kc) > budget and tm > 128:
            tm = max(128, _round_up(tm // 2, 8))
    else:
        tm = pick_tm(1024)            # big tm = weight-byte reuse (HBM-bound fix)
        while need_bytes(tm, False, kc) > budget:
            if kc > 512:
                new_kc = _pick_dff_chunk(d_ff, kc // 2)
                if new_kc < kc:
                    kc = new_kc
                    continue
            if tm > 128:
                tm = max(128, _round_up(tm // 2, 8))
                continue
            if kc > 128:
                new_kc = _pick_dff_chunk(d_ff, kc // 2)
                if new_kc < kc:
                    kc = new_kc
                    continue
            break

    return resident, tm, kc, budget


# ---------------------------------------------------------------------------
# Public wrapper
# ---------------------------------------------------------------------------


@functools.partial(jax.jit, static_argnames=("mode",))
def t5_dense_act_dense(hidden_states, wi_weight, wo_weight, *, mode="auto"):
    """T5DenseActDense forward (eval mode).

    hidden_states: [B, S, d_model]
    wi_weight:     [d_ff, d_model]   (torch nn.Linear layout)
    wo_weight:     [d_model, d_ff]   (torch nn.Linear layout)
    mode: "auto" | "resident" | "streamed"
    """
    B, S, d_model = hidden_states.shape
    d_ff = wi_weight.shape[0]
    M = B * S
    out_dtype = wo_weight.dtype       # torch casts h to wo.weight.dtype

    resident, tm, kc, vmem_limit = _plan(
        M, d_model, d_ff,
        jnp.dtype(hidden_states.dtype).itemsize,
        jnp.dtype(wi_weight.dtype).itemsize,
        jnp.dtype(out_dtype).itemsize,
        mode)

    x = hidden_states.reshape(M, d_model)
    m_pad = _round_up(M, tm)
    if m_pad != M:
        x = jnp.pad(x, ((0, m_pad - M), (0, 0)))
    m_tiles = m_pad // tm
    nc = d_ff // kc                    # _pick_dff_chunk guarantees kc | d_ff

    flops = 4 * m_pad * d_model * d_ff
    x_bytes = m_pad * d_model * jnp.dtype(hidden_states.dtype).itemsize
    o_bytes = m_pad * d_model * jnp.dtype(out_dtype).itemsize
    w_bytes = 2 * d_model * d_ff * jnp.dtype(wi_weight.dtype).itemsize
    w_passes = 1 if resident else m_tiles
    cost = pl.CostEstimate(flops=flops, transcendentals=0,
                           bytes_accessed=x_bytes + o_bytes + w_passes * w_bytes)

    if resident:
        kernel = functools.partial(_ffn_kernel_resident, kc=kc, nc=nc)
        grid_spec = pltpu.PrefetchScalarGridSpec(
            num_scalar_prefetch=0,
            grid=(m_tiles,),
            in_specs=[
                pl.BlockSpec((tm, d_model), lambda i: (i, 0)),
                # Full-array blocks with a constant index_map: Pallas DMAs the
                # weights into VMEM exactly once; every token tile reuses them.
                pl.BlockSpec((d_ff, d_model), lambda i: (0, 0)),
                pl.BlockSpec((d_model, d_ff), lambda i: (0, 0)),
            ],
            out_specs=pl.BlockSpec((tm, d_model), lambda i: (i, 0)),
            scratch_shapes=[pltpu.VMEM((tm, d_model), jnp.float32)],
        )
        dim_sem = ("parallel",)
    else:
        kernel = _ffn_kernel_streamed
        grid_spec = pltpu.PrefetchScalarGridSpec(
            num_scalar_prefetch=0,
            grid=(m_tiles, nc),
            in_specs=[
                pl.BlockSpec((tm, d_model), lambda i, k: (i, 0)),
                pl.BlockSpec((kc, d_model), lambda i, k: (k, 0)),
                pl.BlockSpec((d_model, kc), lambda i, k: (0, k)),
            ],
            out_specs=pl.BlockSpec((tm, d_model), lambda i, k: (i, 0)),
            scratch_shapes=[pltpu.VMEM((tm, d_model), jnp.float32)],
        )
        dim_sem = ("parallel", "arbitrary")

    out = pl.pallas_call(
        kernel,
        out_shape=jax.ShapeDtypeStruct((m_pad, d_model), out_dtype),
        grid_spec=grid_spec,
        compiler_params=pltpu.CompilerParams(
            dimension_semantics=dim_sem,
            vmem_limit_bytes=vmem_limit,
        ),
        cost_estimate=cost,
    )(x, wi_weight, wo_weight)

    if m_pad != M:
        out = out[:M]
    return out.reshape(B, S, d_model)


def _reference(hidden_states, wi_weight, wo_weight):
    h = hidden_states @ wi_weight.T
    h = jnp.maximum(h, 0.0)
    return h @ wo_weight.T


if __name__ == "__main__":
    key = jax.random.PRNGKey(0)
    kx, kwi, kwo, kx2 = jax.random.split(key, 4)

    # Small T5-like config: batch=2, seq=8, d_model=32, d_ff=64
    B, S, d_model, d_ff = 2, 8, 32, 64
    hidden_states = jax.random.normal(kx, (B, S, d_model), dtype=jnp.float32)
    # torch nn.Linear layout: [out_features, in_features]
    wi_weight = jax.random.normal(kwi, (d_ff, d_model), dtype=jnp.float32) * (d_model ** -0.5)
    wo_weight = jax.random.normal(kwo, (d_model, d_ff), dtype=jnp.float32) * (d_ff ** -0.5)

    ref = _reference(hidden_states, wi_weight, wo_weight)

    # Resident-weights path (the common case: wi+wo fit comfortably in VMEM).
    out_r = jax.block_until_ready(
        t5_dense_act_dense(hidden_states, wi_weight, wo_weight, mode="resident"))
    assert out_r.shape == (B, S, d_model)
    assert jnp.allclose(out_r, ref, atol=1e-4, rtol=1e-4), "resident path mismatch"

    # Streaming fallback path (used when the weights do not fit in VMEM).
    out_s = jax.block_until_ready(
        t5_dense_act_dense(hidden_states, wi_weight, wo_weight, mode="streamed"))
    assert jnp.allclose(out_s, ref, atol=1e-4, rtol=1e-4), "streamed path mismatch"

    # Auto mode + non-tile-divisible token count (exercises padding path).
    hidden_states2 = jax.random.normal(kx2, (2, 5, d_model), dtype=jnp.float32)
    out2 = jax.block_until_ready(
        t5_dense_act_dense(hidden_states2, wi_weight, wo_weight))
    ref2 = _reference(hidden_states2, wi_weight, wo_weight)
    assert out2.shape == (2, 5, d_model)
    assert jnp.allclose(out2, ref2, atol=1e-4, rtol=1e-4), "padded path mismatch"

    # bf16 path (the dtype the real model should run in, per perf review).
    hs_b = hidden_states.astype(jnp.bfloat16)
    wi_b = wi_weight.astype(jnp.bfloat16)
    wo_b = wo_weight.astype(jnp.bfloat16)
    out_b = jax.block_until_ready(t5_dense_act_dense(hs_b, wi_b, wo_b))
    ref_b = _reference(hs_b.astype(jnp.float32), wi_b.astype(jnp.float32),
                       wo_b.astype(jnp.float32))
    assert out_b.dtype == jnp.bfloat16
    assert jnp.allclose(out_b.astype(jnp.float32), ref_b, atol=5e-2, rtol=5e-2), \
        "bf16 path mismatch"

    print("KERNEL_OK")
</pallas_src>

<mosaic_0001>
module attributes {stable_mosaic.version = 11 : i64} {
  func.func @_ffn_kernel_resident(%arg0: i32, %arg1: memref<16x32xf32, #tpu.memory_space<vmem>>, %arg2: memref<64x32xf32, #tpu.memory_space<vmem>>, %arg3: memref<32x64xf32, #tpu.memory_space<vmem>>, %arg4: memref<16x32xf32, #tpu.memory_space<vmem>>, %arg5: memref<16x32xf32, #tpu.memory_space<vmem>>) attributes {dimension_semantics = [#tpu.dimension_semantics<parallel>], iteration_bounds = array<i64: 1>, scalar_prefetch = 0 : i64, scratch_operands = 1 : i64, tpu.core_type = #tpu.core_type<tc>, window_params = [{transform_indices = @transform_0, window_bounds = array<i64: 16, 32>}, {pipeline_mode = #tpu.pipeline_mode<synchronous>, transform_indices = @transform_1, window_bounds = array<i64: 64, 32>}, {pipeline_mode = #tpu.pipeline_mode<synchronous>, transform_indices = @transform_2, window_bounds = array<i64: 32, 64>}, {transform_indices = @transform_3, window_bounds = array<i64: 16, 32>}]} {
    %c0 = arith.constant 0 : index
    %c0_0 = arith.constant 0 : index
    %0 = vector.load %arg1[%c0, %c0_0] : memref<16x32xf32, #tpu.memory_space<vmem>>, vector<16x32xf32>
    %c0_1 = arith.constant 0 : index
    %c0_2 = arith.constant 0 : index
    %1 = vector.load %arg2[%c0_1, %c0_2] : memref<64x32xf32, #tpu.memory_space<vmem>>, vector<64x32xf32>
    %cst = arith.constant dense<0.000000e+00> : vector<16x64xf32>
    %2 = tpu.matmul %0, %1, %cst {dimension_numbers = #tpu.dot_dimension_numbers<[1], [1], [0], [0], [0, 0, 1, 0], [], []>} : vector<16x32xf32>, vector<64x32xf32>, vector<16x64xf32> -> vector<16x64xf32>
    %cst_3 = arith.constant 0.000000e+00 : f32
    %3 = vector.broadcast %cst_3 : f32 to vector<16x64xf32>
    %4 = arith.maximumf %2, %3 : vector<16x64xf32>
    %c0_4 = arith.constant 0 : index
    %c0_5 = arith.constant 0 : index
    %5 = vector.load %arg3[%c0_4, %c0_5] : memref<32x64xf32, #tpu.memory_space<vmem>>, vector<32x64xf32>
    %cst_6 = arith.constant dense<0.000000e+00> : vector<16x32xf32>
    %6 = tpu.matmul %4, %5, %cst_6 {dimension_numbers = #tpu.dot_dimension_numbers<[1], [1], [0], [0], [0, 0, 1, 0], [], []>} : vector<16x64xf32>, vector<32x64xf32>, vector<16x32xf32> -> vector<16x32xf32>
    %c0_7 = arith.constant 0 : index
    %c0_8 = arith.constant 0 : index
    %7 = vector.load %arg4[%c0_7, %c0_8] : memref<16x32xf32, #tpu.memory_space<vmem>>, vector<16x32xf32>
    tpu.vector_store %arg4[%c0_7, %c0_8], %6 {strides = array<i32>} : memref<16x32xf32, #tpu.memory_space<vmem>>, vector<16x32xf32>,
    return
  }
  func.func @transform_0(%arg0: i32) -> (i32, i32) {
    %c0_i32 = arith.constant 0 : i32
    %c0_i32_0 = arith.constant 0 : i32
    return %arg0, %c0_i32 : i32, i32
  }
  func.func @transform_1(%arg0: i32) -> (i32, i32) {
    %c0_i32 = arith.constant 0 : i32
    %c0_i32_0 = arith.constant 0 : i32
    %c0_i32_1 = arith.constant 0 : i32
    return %c0_i32, %c0_i32_0 : i32, i32
  }
  func.func @transform_2(%arg0: i32) -> (i32, i32) {
    %c0_i32 = arith.constant 0 : i32
    %c0_i32_0 = arith.constant 0 : i32
    %c0_i32_1 = arith.constant 0 : i32
    return %c0_i32, %c0_i32_0 : i32, i32
  }
  func.func @transform_3(%arg0: i32) -> (i32, i32) {
    %c0_i32 = arith.constant 0 : i32
    %c0_i32_0 = arith.constant 0 : i32
    return %arg0, %c0_i32 : i32, i32
  }
}

</mosaic_0001>

<bundles_post_ra>
// kernel: t5_dense_act_dense.1
= control target key start
LH: loop header
LB: loop body
LE: loop exit
PB: predicated region body
PF: predicated region fallthrough
CT: control target
= control target key end

     0   :  { %vm25_vm0 = vcmask 261120   ;;  %vm137_vm2 = vcmask 523264   ;;  %s493_s0 = inlined_call_operand.vmem [shape: f32[16,32], index: 0, kind: input, shape index: {}]   ;;  %s494_s1 = inlined_call_operand.vmem [shape: f32[64,32], index: 1, kind: input, shape index: {}]   ;;  %s495_s2 = inlined_call_operand.vmem [shape: f32[32,64], index: 2, kind: input, shape index: {}]   ;;  %s496_s3 = inlined_call_operand.hbm [shape: f32[16,32], index: 3, kind: output, shape index: {}]  }
   0x1   :  { %v17_v0 = vld [vmem:[%s494_s1] sm:$0xff]  ;;  %v18_v1 = vld [vmem:[%s494_s1 + $0x8] sm:$0xff]  ;;  %v19_v2 = vld [vmem:[%s494_s1 + $0x10] sm:$0xff] }
   0x2   :  { %v311_v3 = vpack.c.bf16 %v18_v1, %v17_v0  ;;  %vm408_vm1 = vmpackc.low %vm25_vm0, %vm25_vm0  ;;  %v20_v5 = vld [vmem:[%s494_s1 + $0x18] sm:$0xff]  ;;  %v15_v7 = vld [vmem:[%s493_s0] sm:$0xff] }
   0x3   :  { %v317_v6 = vpack.c.bf16 %v20_v5, %v19_v2  ;;  %v133_v8 = vld [vmem:[%s495_s2] sm:$0xff]  ;;  %297 = vmatprep.mubr.msk.f32.mxu0 %vm25_vm0, %v15_v7  ;;  %v134_v9 = vld [vmem:[%s495_s2 + $0x8] sm:$0xff]  ;;  %vm431_vm3 = vmpackc.low %vm137_vm2, %vm137_vm2 }
   0x4   :  { %313 = vmatprep.subr.msk.bf16.mxu0 %vm408_vm1, %v311_v3  ;;  %v135_v11 = vld [vmem:[%s495_s2 + $0x10] sm:$0xff]  ;;  %v335_v12 = vpack.c.bf16 %v134_v9, %v133_v8  ;;  %v136_v13 = vld [vmem:[%s495_s2 + $0x18] sm:$0xff] }
   0x5   :  { %316 = vmatpush3.bf16.xpose.msk.msra.mxu0 %vm408_vm1, %v311_v3 }
   0x6   :  { %319 = vmatprep.subr.msk.bf16.mxu0 %vm408_vm1, %v317_v6 }
   0x7   :  { %8 = vsyncpa [#allocation4], 0  ;;  %v21_v14 = vld [vmem:[%s494_s1 + $0x20] sm:$0xff]  ;;  %v22_v15 = vld [vmem:[%s494_s1 + $0x28] sm:$0xff]  ;;  %v341_v16 = vpack.c.bf16 %v136_v13, %v135_v11  ;;  %337 = vmatprep.subr.msk.bf16.mxu1 %vm431_vm3, %v335_v12 }
   0x8   :  { %340 = vmatpush3.bf16.xpose.msk.msra.mxu1 %vm431_vm3, %v335_v12  ;;  %v323_v17 = vpack.c.bf16 %v22_v15, %v21_v14  ;;  %v23_v18 = vld [vmem:[%s494_s1 + $0x30] sm:$0xff]  ;;  %v24_v19 = vld [vmem:[%s494_s1 + $0x38] sm:$0xff]  ;;  %v16_v21 = vld [vmem:[%s493_s0 + $0x8] sm:$0xff]  ;;  %s374_s1 = smov [#allocation3]  }
   0x9   :  { %343 = vmatprep.subr.msk.bf16.mxu1 %vm431_vm3, %v341_v16  ;;  %v329_v20 = vpack.c.bf16 %v24_v19, %v23_v18  ;;  %s238_s12 = sshll.u32 %s374_s1, 4  ;;  %s239_s12 = int_to_ptr.vmem [resolvable:$true] %s238_s12 }
   0xa   :  { %s350_s0 = scalar_lea.vmem %s239_s12, 256  ;;  %p355_p1 = scmp.lt.s32.totalorder %s239_s12, %s239_s12 }
   0xb   :  { %p351_p0 = scmp.ne.s32.totalorder %s239_s12, %s350_s0  ;;  %p356_p2 = scmp.lt.s32.totalorder %s350_s0, %s350_s0 }
   0xd   :  { %322 = vmatpush3.bf16.xpose.msk.msra.mxu0 %vm408_vm1, %v317_v6  ;;  %p357_p3 = por %p356_p2, %p355_p1 }
   0xe   :  { %325 = vmatprep.subr.msk.bf16.mxu0 %vm408_vm1, %v323_v17 }
   0xf   :  { %p358_p4 = pnand %p357_p3, %p351_p0 }
  0x10   :  { %346 = vmatpush3.bf16.xpose.msk.msra.mxu1 %vm431_vm3, %v341_v16 }
  0x15   :  { %328 = vmatpush3.bf16.xpose.msk.msra.mxu0 %vm408_vm1, %v323_v17 }
  0x16   :  { %331 = vmatprep.subr.msk.bf16.mxu0 %vm408_vm1, %v329_v20 }
  0x1d   :  { %334 = vmatpush3.bf16.xpose.msk.msra.mxu0 %vm408_vm1, %v329_v20 }
  0x24   :  { %298 = vmatmul.mubr.msk.f32.vlgmr.msra.gmra.mrb[0].mxu0 %vm25_vm0, %v16_v21 }
  0xf7   :  { %v299_v22 = vpop.f32.mrb[0].mxu0 }
  0xf8   :  { %v122_v23 = vpop.f32.mrb[1].mxu0  ;;  %v132_v25 = vmax.f32 %v299_v22, 0.0 }
  0xf9   :  { %v131_v24 = vmax.f32 %v122_v23, 0.0 }
  0xfb   :  { %308 = vmatprep.mubr.msk.f32.mxu1 %vm137_vm2, %v131_v24 }
  0xfc   :  { %309 = vmatmul.mubr.msk.f32.vlgmr.msra.gmra.mrb[0].mxu1 %vm137_vm2, %v132_v25 }
 0x1cf   :  { %v310_v26 = vpop.f32.mrb[0].mxu1 }
 0x1d0   :  { %232 = vst.msk [vmem:[#allocation3 + $0x8] sm:$0xff] %vm25_vm0, %v310_v26  ;;  %v222_v27 = vpop.f32.mrb[1].mxu1 }
 0x1d1   :  { %231 = vst.msk [vmem:[#allocation3] sm:$0xff] %vm25_vm0, %v222_v27 }
 0x1d2   :  { %361 = shalt.err (!%p358_p4)
}
 0x1d3   :  { %s362_s15 = scalar_lea.hbm %s496_s3, 256 }
 0x1d4   :  { %p363_p5 = scmp.ne.s32.totalorder %s496_s3, %s362_s15  ;;  %p366_p6 = scmp.lt.u32.totalorder %s362_s15, %s496_s3 }
 0x1d6   :  { %p368_p7 = pnand %p366_p6, %p363_p5 }
 0x1d8   :  { %371 = shalt.err (!%p368_p7)
}
 0x1d9   :  { %s375_s20 = smov 128   ;;  %s376_s21 = smov 8  }
 0x1da   :  { %244 = dma.vmem_to_hbm [thread:$0]  %s239_s12, 256, %s496_s3, [#allocation4], %s375_s20, %s375_s20, %s376_s21  }
 0x1db   :  { %372 = dma.done.wait [#allocation4], 256  }
 0x1dc   :  { %373 = vsyncadd [#allocation4], 4294967040 }
 0x1dd   :  { %248 = vsyncpa [#allocation4], 1 }

</bundles_post_ra>
